<compile_context>
chip_gen: v7x
topology: tpu7x:2x2x1
jax: 0.10.0
libtpu: 0.0.40
codegen_flags: <defaults>
</compile_context>

<pallas_src>
import math

import jax
import jax.numpy as jnp
from jax.experimental import pallas as pl
from jax.experimental.pallas import tpu as pltpu


def head_kernel(x_ref, wqkv_ref, o_ref, qkv_scratch):
    """One grid step = `Bb` batch elements of causal single-head attention.

    x_ref:       (Bb*T, C)   batch-folded activations (compute dtype, e.g. bf16)
    wqkv_ref:    (C, 3*H)    fused [Wq * 1/sqrt(H) | Wk | Wv] (compute dtype)
    o_ref:       (Bb, T, H)  output block (f32)
    qkv_scratch: (Bb*T, 3*H) f32 VMEM scratch holding the fused projection
    """
    Bb, T, H = o_ref.shape

    # ---- fused QKV projection on the folded (Bb*T, C) matrix: one MXU pass ----
    qkv_scratch[...] = jnp.dot(x_ref[...], wqkv_ref[...],
                               preferred_element_type=jnp.float32)

    # Static lane slices from the scratch ref; split rows back into (Bb, T, .).
    q = qkv_scratch[:, 0:H].reshape(Bb, T, H)        # 1/sqrt(H) already folded in
    k = qkv_scratch[:, H:2 * H].reshape(Bb, T, H)
    v = qkv_scratch[:, 2 * H:3 * H].reshape(Bb, T, H)

    # ---- scores = q @ k^T (batched, contract the head dim; no k transpose) ----
    scores = jax.lax.dot_general(
        q, k,
        dimension_numbers=(((2,), (2,)), ((0,), (0,))),
        preferred_element_type=jnp.float32)           # (Bb, T, T)

    # ---- causal (tril) mask; finite large-negative is robust to fully-masked rows ----
    row = jax.lax.broadcasted_iota(jnp.int32, (Bb, T, T), 1)
    col = jax.lax.broadcasted_iota(jnp.int32, (Bb, T, T), 2)
    scores = jnp.where(col <= row, scores, jnp.float32(-1e30))

    # ---- numerically stable softmax; normalization deferred to the output ----
    m = jnp.max(scores, axis=-1, keepdims=True)
    p = jnp.exp(scores - m)                            # (Bb, T, T)
    denom = jnp.sum(p, axis=-1, keepdims=True)         # >= 1 for causal rows
    inv = pl.reciprocal(denom, approx=True)            # EUP slot, keeps VALU free

    out = jax.lax.dot_general(
        p, v,
        dimension_numbers=(((2,), (1,)), ((0,), (0,))),
        preferred_element_type=jnp.float32)            # (Bb, T, H)
    o_ref[...] = (out * inv).astype(o_ref.dtype)       # deferred normalization


def head_forward(x, wk, wq, wv, *, batch_block=None, compute_dtype=jnp.bfloat16):
    """Causal single-head self-attention.  x: (B, T, C); wk/wq/wv: (C, H) -> (B, T, H)."""
    B, T, C = x.shape
    H = wk.shape[1]

    if batch_block is None:
        # Give the MXU a useful M (~128 folded rows) per grid step, but keep >= 2
        # grid steps when B allows so the "parallel" axis can span both v7x TCs.
        batch_block = min(B, max(1, 128 // max(T, 1)))
        if batch_block >= B and B > 1:
            batch_block = B // 2
        while B % batch_block:
            batch_block -= 1
    assert B % batch_block == 0, "batch_block must divide B"

    # Fuse [Wq | Wk | Wv] into one (C, 3H) weight; fold 1/sqrt(H) into the q columns.
    scale = 1.0 / math.sqrt(H)
    w_qkv = jnp.concatenate([wq * scale, wk, wv], axis=1)

    # bf16 inputs feed the MXU at full rate on v6e/v7x (f32 accumulation is kept via
    # preferred_element_type inside the kernel); batch is folded into rows here so
    # the kernel never reshapes packed bf16 data.
    x_folded = x.reshape(B * T, C).astype(compute_dtype)
    w_c = w_qkv.astype(compute_dtype)

    grid = (B // batch_block,)
    return pl.pallas_call(
        head_kernel,
        out_shape=jax.ShapeDtypeStruct((B, T, H), x.dtype),
        grid=grid,
        in_specs=[
            pl.BlockSpec((batch_block * T, C), lambda b: (b, 0)),
            pl.BlockSpec((C, 3 * H), lambda b: (0, 0)),
        ],
        out_specs=pl.BlockSpec((batch_block, T, H), lambda b: (b, 0, 0)),
        scratch_shapes=[pltpu.VMEM((batch_block * T, 3 * H), jnp.float32)],
        compiler_params=pltpu.CompilerParams(
            dimension_semantics=("parallel",)),
    )(x_folded, w_c)


def head_reference(x, wk, wq, wv):
    """Pure-JAX float32 reference mirroring the PyTorch forward."""
    k = x @ wk
    q = x @ wq
    v = x @ wv
    H = k.shape[-1]
    scores = jnp.einsum("bth,bsh->bts", q, k) / (H ** 0.5)
    T = x.shape[1]
    tril = jnp.tril(jnp.ones((T, T), dtype=bool))
    scores = jnp.where(tril, scores, -jnp.inf)
    w = jax.nn.softmax(scores, axis=-1)
    return w @ v


if __name__ == "__main__":
    # Small shapes consistent with the module: block_size T=8, n_embd C=32,
    # head_size H=16; B=4 so the batch-block grid has 2 "parallel" steps.
    B, T, C, H = 4, 8, 32, 16

    key = jax.random.PRNGKey(0)
    kx, kk, kq, kv = jax.random.split(key, 4)
    x = jax.random.normal(kx, (B, T, C), dtype=jnp.float32)
    wk = jax.random.normal(kk, (C, H), dtype=jnp.float32) * (1.0 / C ** 0.5)
    wq = jax.random.normal(kq, (C, H), dtype=jnp.float32) * (1.0 / C ** 0.5)
    wv = jax.random.normal(kv, (C, H), dtype=jnp.float32) * (1.0 / C ** 0.5)

    out = head_forward(x, wk, wq, wv, batch_block=2)    # grid=(2,), bf16 MXU inputs
    out = jax.block_until_ready(out)
    assert out.shape == (B, T, H)

    # Compare against the f32 reference at matching input precision (the kernel
    # feeds the MXU bf16 inputs with f32 accumulation).  Tolerance also covers the
    # approximate (EUP) reciprocal used for the softmax normalization.
    bf = lambda a: a.astype(jnp.bfloat16).astype(jnp.float32)
    ref = head_reference(bf(x), bf(wk), bf(wq), bf(wv))
    assert jnp.allclose(out, ref, atol=2e-2, rtol=2e-2), (
        "max abs err = %f" % float(jnp.max(jnp.abs(out - ref))))

    print("KERNEL_OK")
</pallas_src>

<mosaic_0001>
module attributes {stable_mosaic.version = 11 : i64} {
  func.func @head_kernel(%arg0: i32, %arg1: memref<16x32xbf16, #tpu.memory_space<vmem>>, %arg2: memref<32x48xbf16, #tpu.memory_space<vmem>>, %arg3: memref<2x8x16xf32, #tpu.memory_space<vmem>>, %arg4: memref<16x48xf32, #tpu.memory_space<vmem>>) attributes {dimension_semantics = [#tpu.dimension_semantics<parallel>], iteration_bounds = array<i64: 2>, scalar_prefetch = 0 : i64, scratch_operands = 1 : i64, tpu.core_type = #tpu.core_type<tc>, window_params = [{transform_indices = @transform_0, window_bounds = array<i64: 16, 32>}, {pipeline_mode = #tpu.pipeline_mode<synchronous>, transform_indices = @transform_1, window_bounds = array<i64: 32, 48>}, {transform_indices = @transform_2, window_bounds = array<i64: 2, 8, 16>}]} {
    %c0 = arith.constant 0 : index
    %c0_0 = arith.constant 0 : index
    %0 = vector.load %arg1[%c0, %c0_0] : memref<16x32xbf16, #tpu.memory_space<vmem>>, vector<16x32xbf16>
    %c0_1 = arith.constant 0 : index
    %c0_2 = arith.constant 0 : index
    %1 = vector.load %arg2[%c0_1, %c0_2] : memref<32x48xbf16, #tpu.memory_space<vmem>>, vector<32x48xbf16>
    %cst = arith.constant dense<0.000000e+00> : vector<16x48xf32>
    %2 = tpu.matmul %0, %1, %cst {dimension_numbers = #tpu.dot_dimension_numbers<[1], [0], [0], [1], [0, 0, 1, 1], [], []>} : vector<16x32xbf16>, vector<32x48xbf16>, vector<16x48xf32> -> vector<16x48xf32>
    %c0_3 = arith.constant 0 : index
    %c0_4 = arith.constant 0 : index
    %3 = vector.load %arg4[%c0_3, %c0_4] : memref<16x48xf32, #tpu.memory_space<vmem>>, vector<16x48xf32>
    tpu.vector_store %arg4[%c0_3, %c0_4], %2 {strides = array<i32>} : memref<16x48xf32, #tpu.memory_space<vmem>>, vector<16x48xf32>,
    %c0_5 = arith.constant 0 : index
    %c0_6 = arith.constant 0 : index
    %4 = vector.load %arg4[%c0_5, %c0_6] : memref<16x48xf32, #tpu.memory_space<vmem>>, vector<16x16xf32>
    %5 = vector.shape_cast %4 : vector<16x16xf32> to vector<2x8x16xf32>
    %c0_7 = arith.constant 0 : index
    %c16 = arith.constant 16 : index
    %6 = vector.load %arg4[%c0_7, %c16] : memref<16x48xf32, #tpu.memory_space<vmem>>, vector<16x16xf32>
    %7 = vector.shape_cast %6 : vector<16x16xf32> to vector<2x8x16xf32>
    %c0_8 = arith.constant 0 : index
    %c32 = arith.constant 32 : index
    %8 = vector.load %arg4[%c0_8, %c32] : memref<16x48xf32, #tpu.memory_space<vmem>>, vector<16x16xf32>
    %9 = vector.shape_cast %8 : vector<16x16xf32> to vector<2x8x16xf32>
    %cst_9 = arith.constant dense<0.000000e+00> : vector<2x8x8xf32>
    %10 = tpu.matmul %5, %7, %cst_9 {dimension_numbers = #tpu.dot_dimension_numbers<[2], [2], [1], [1], [0, 0, 0, 1, 1, 1], [0], [0]>} : vector<2x8x16xf32>, vector<2x8x16xf32>, vector<2x8x8xf32> -> vector<2x8x8xf32>
    %11 = tpu.iota {dimensions = array<i32: 1>} : vector<2x8x8xi32>
    %12 = tpu.iota {dimensions = array<i32: 2>} : vector<2x8x8xi32>
    %13 = arith.cmpi sle, %12, %11 : vector<2x8x8xi32>
    %cst_10 = arith.constant -1.000000e+30 : f32
    %14 = vector.broadcast %cst_10 : f32 to vector<2x8x8xf32>
    %15 = arith.select %13, %10, %14 : vector<2x8x8xi1>, vector<2x8x8xf32>
    %cst_11 = arith.constant dense<0xFF800000> : vector<2x8xf32>
    %16 = vector.multi_reduction <maximumf>, %15, %cst_11 [2] : vector<2x8x8xf32> to vector<2x8xf32>
    %17 = vector.shape_cast %16 : vector<2x8xf32> to vector<2x8x1xf32>
    %18 = vector.broadcast %17 : vector<2x8x1xf32> to vector<2x8x8xf32>
    %19 = arith.subf %15, %18 : vector<2x8x8xf32>
    %20 = math.exp %19 : vector<2x8x8xf32>
    %cst_12 = arith.constant dense<0.000000e+00> : vector<2x8xf32>
    %21 = vector.multi_reduction <add>, %20, %cst_12 [2] : vector<2x8x8xf32> to vector<2x8xf32>
    %22 = vector.shape_cast %21 : vector<2x8xf32> to vector<2x8x1xf32>
    %23 = tpu.reciprocal %22 {approx = true} : vector<2x8x1xf32> -> vector<2x8x1xf32>
    %cst_13 = arith.constant dense<0.000000e+00> : vector<2x8x16xf32>
    %24 = tpu.matmul %20, %9, %cst_13 {dimension_numbers = #tpu.dot_dimension_numbers<[2], [1], [1], [2], [0, 0, 0, 1, 1, 2], [0], [0]>} : vector<2x8x8xf32>, vector<2x8x16xf32>, vector<2x8x16xf32> -> vector<2x8x16xf32>
    %25 = vector.broadcast %23 : vector<2x8x1xf32> to vector<2x8x16xf32>
    %26 = arith.mulf %24, %25 : vector<2x8x16xf32>
    %c0_14 = arith.constant 0 : index
    %c0_15 = arith.constant 0 : index
    %c0_16 = arith.constant 0 : index
    %27 = vector.load %arg3[%c0_14, %c0_15, %c0_16] : memref<2x8x16xf32, #tpu.memory_space<vmem>>, vector<2x8x16xf32>
    tpu.vector_store %arg3[%c0_14, %c0_15, %c0_16], %26 {strides = array<i32>} : memref<2x8x16xf32, #tpu.memory_space<vmem>>, vector<2x8x16xf32>,
    return
  }
  func.func @transform_0(%arg0: i32) -> (i32, i32) {
    %c0_i32 = arith.constant 0 : i32
    %c0_i32_0 = arith.constant 0 : i32
    return %arg0, %c0_i32 : i32, i32
  }
  func.func @transform_1(%arg0: i32) -> (i32, i32) {
    %c0_i32 = arith.constant 0 : i32
    %c0_i32_0 = arith.constant 0 : i32
    %c0_i32_1 = arith.constant 0 : i32
    return %c0_i32, %c0_i32_0 : i32, i32
  }
  func.func @transform_2(%arg0: i32) -> (i32, i32, i32) {
    %c0_i32 = arith.constant 0 : i32
    %c0_i32_0 = arith.constant 0 : i32
    %c0_i32_1 = arith.constant 0 : i32
    return %arg0, %c0_i32, %c0_i32_0 : i32, i32, i32
  }
}

</mosaic_0001>

<bundles_post_ra>
// kernel: tpu_custom_call.1
= control target key start
LH: loop header
LB: loop body
LE: loop exit
PB: predicated region body
PF: predicated region fallthrough
CT: control target
= control target key end

     0   :  { %7 = vsyncpa [#allocation4], 0  ;;  %s1213_s0 = inlined_call_operand.hbm [shape: bf16[32,32], index: 0, kind: input, shape index: {}]   ;;  %s1214_s1 = inlined_call_operand.hbm [shape: bf16[32,48], index: 1, kind: input, shape index: {}]   ;;  %s1215_s2 = inlined_call_operand.hbm [shape: f32[4,8,16], index: 2, kind: output, shape index: {}]  }
   0x1   :  { %9 = vsyncpa [#allocation4 + $0x1], 0 }
   0x2   :  { %10 = vsyncpa [#allocation7], 0 }
   0x3   :  { %11 = vsyncpa [#allocation5], 0 }
   0x4   :  { %13 = vsyncpa [#allocation5 + $0x1], 0  ;;  %s988_s9 = smov 0   ;;  %s990_s10 = smov 0  }
   0x5   :  { %s992_s11 = smov 0   ;;  %s994_s12 = smov 0  }
   0x6 LB: > { %s1009_s13 = sadd.s32 4294967295, %s960_s12   ;;  %s689_s14 = sadd.s32 4294967294, %s960_s12   ;;  %s960_s12 = sphi %s994_s12, %s1235_s12   ;;  %s956_s11 = sphi %s992_s11, %s1234_s11   ;;  %s952_s10 = sphi %s990_s10, %s1233_s10   ;;  %s948_s9 = sphi %s988_s9, %s1232_s9  }
   0x7   : > { %p39_p0 = scmp.ne.s32.totalorder %s952_s10, %s948_s9  ;;  %p1216_p1 = scmp.eq.s32.totalorder %s1009_s13, 0 }
   0x8   : > { %p90_p3 = scmp.eq.s32.totalorder %s689_s14, 1  ;;  %p690_p5 = scmp.ge.s32.totalorder %s960_s12, 1 }
   0x9   : > { %p1018_p4 = por %p1216_p1, %p39_p0  ;;  %p97_p7 = scmp.lt.s32.totalorder %s960_s12, 3 }
   0xa   : > { %p1023_p6 = por %p90_p3, %p39_p0  ;;  %s962_s18 = smov [#allocation6]  }
   0xb   : > { %s1219_s15 = scalar_select %p1018_p4, 1, 0 }
   0xc   : > { %s1220_s16 = scalar_select %p1023_p6, 1, 0 }
   0xd   : > { %p1028_p8 = pnand %p690_p5, %p97_p7  ;;  %s109_s19 = sshll.u32 %s962_s18, 4  ;;  %s1032_s19 = int_to_ptr.vmem [resolvable:$true] %s109_s19 }
   0xe   : > { %s1044_s21 = sadd.s32 1, %s960_s12   ;;  %s26_s22 = sadd.s32 1, %s956_s11 }
   0xf   : > { %s1221_s17 = scalar_select %p1028_p8, 1, 0 }
  0x10   : > { %p764_p9 = pneg %p1028_p8  ;;  %s23_s23 = ssub.s32 %s960_s12, %s1044_s21 }
  0x11   : > { %s832_s26 = scalar_lea.hbm %s1214_s1, 256 }
  0x12   : > { %p1039_p11 = pnand %p764_p9, %p1216_p1  ;;  %p833_p12 = scmp.ne.s32.totalorder %s1214_s1, %s832_s26 }
  0x13   : > { %p839_p5 = scmp.lt.u32.totalorder %s832_s26, %s1214_s1 }
  0x14   : > { %p834_p13 = pneg %p1039_p11 }
  0x16   : > { %p835_p0 = pnand %p834_p13, %p833_p12 }
  0x18   : > { %p836_p3 = pneg %p835_p0 }
  0x1a   : > { %p841_p7 = pnand %p839_p5, %p836_p3 }
  0x1c   : > { %844 = shalt.err (!%p841_p7)
}
  0x1d   : > { %s845_s3 = scalar_lea.vmem %s1032_s19, 256  ;;  %p853_p2 = scmp.lt.s32.totalorder %s1032_s19, %s1032_s19 }
  0x1e   : > { %p846_p9 = scmp.ne.s32.totalorder %s1032_s19, %s845_s3  ;;  %p854_p6 = scmp.lt.s32.totalorder %s845_s3, %s845_s3 }
  0x20   : > { %p848_p10 = pnand %p846_p9, %p834_p13  ;;  %p855_p4 = por %p854_p6, %p853_p2 }
  0x22   : > { %p849_p1 = pneg %p848_p10 }
  0x24   : > { %p856_p8 = pnand %p855_p4, %p849_p1 }
  0x26   : > { %859 = shalt.err (!%p856_p8)
}
  0x27   : > { %s963_s4 = smov 64   ;;  %s964_s5 = smov 4  }
  0x28   : > { %767 = dma.hbm_to_vmem [thread:$0]  (!%p1039_p11), %s1214_s1, 256, %s1032_s19, [#allocation7], %s963_s4, %s963_s4, %s964_s5  }
  0x29   : > { %p24_p1 = scmp.eq.s32.totalorder %s23_s23, 0  ;;  %p33_p2 = scmp.ne.s32.totalorder %s956_s11, %s952_s10 }
  0x2a   : > { %p34_p4 = scmp.eq.s32.totalorder %s960_s12, 0  ;;  %p777_p6 = scmp.lt.s32.totalorder %s960_s12, 2 }
  0x2b   : > { %s1078_s8 = scalar_select %p24_p1, %s956_s11, %s26_s22  }
  0x2c   : > { %p35_p8 = por %p34_p4, %p33_p2  ;;  %p1223_p10 = scmp.eq.s32.totalorder %s1009_s13, 1 }
  0x2d   : > { %s123_s18 = sand.u32 1, %s956_s11   ;;  %s715_s20 = sshll.u32 %s960_s12, 7 }
  0x2e   : > { %p1082_p12 = por %p1223_p10, %p33_p2  ;;  %s693_s24 = sshll.u32 %s123_s18, 3 }
  0x2f   : > { %s1091_s27 = scalar_lea.hbm %s1213_s0, %s715_s20  ;;  %s127_s19 = scalar_lea.vmem [#allocation3], %s693_s24 }
  0x30   : > { %s134_s22 = sshll.u32 %s127_s19, 4  ;;  %p1093_p11 = pnand %p777_p6, %p35_p8  ;;  %s1097_s22 = int_to_ptr.vmem [resolvable:$true] %s134_s22 }
  0x31   : > { %s1099_s28 = scalar_lea.sflag [#allocation4], %s123_s18  ;;  %s860_s29 = scalar_lea.hbm %s1091_s27, 128 }
  0x32   : > { %p861_p13 = scmp.ne.s32.totalorder %s1091_s27, %s860_s29  ;;  %p862_p0 = pneg %p1093_p11 }
  0x33   : > { %s865_s6 = scalar_lea.hbm %s1213_s0, 256  ;;  %p866_p7 = scmp.lt.u32.totalorder %s1091_s27, %s1213_s0 }
  0x34   : > { %p863_p3 = pnand %p862_p0, %p861_p13  ;;  %p867_p9 = scmp.lt.u32.totalorder %s865_s6, %s860_s29 }
  0x35   : > { %p869_p2 = scmp.lt.u32.totalorder %s860_s29, %s1091_s27 }
  0x36   : > { %p864_p5 = pneg %p863_p3  ;;  %p868_p1 = por %p867_p9, %p866_p7 }
  0x38   : > { %p870_p4 = por %p869_p2, %p868_p1 }
  0x3a   : > { %p871_p6 = pnand %p870_p4, %p864_p5 }
  0x3c   : > { %874 = shalt.err (!%p871_p6)
}
  0x3d   : > { %s875_s18 = scalar_lea.vmem %s1097_s22, 128  ;;  %s965_s24 = smov [#allocation3]  }
  0x3e   : > { %p876_p8 = scmp.ne.s32.totalorder %s1097_s22, %s875_s18  ;;  %s880_s25 = sshll.u32 %s965_s24, 4  ;;  %s881_s25 = int_to_ptr.vmem [resolvable:$false] %s880_s25 }
  0x3f   : > { %s882_s26 = scalar_lea.vmem %s881_s25, 256  ;;  %p883_p3 = scmp.lt.s32.totalorder %s1097_s22, %s881_s25 }
  0x40   : > { %p878_p10 = pnand %p876_p8, %p862_p0  ;;  %p884_p7 = scmp.lt.s32.totalorder %s882_s26, %s875_s18 }
  0x42   : > { %p879_p13 = pneg %p878_p10  ;;  %p885_p9 = por %p884_p7, %p883_p3 }
  0x44   : > { %p886_p1 = pnand %p885_p9, %p879_p13 }
  0x46   : > { %889 = shalt.err (!%p886_p1)
}
  0x47   : > { %771 = dma.hbm_to_vmem [thread:$0]  (!%p1093_p11), %s1091_s27, 128, %s1097_s22, %s1099_s28, %s963_s4, %s963_s4, %s964_s5  }
  0x48   : > { %p1226_p0 = scmp.ne.s32.totalorder %s1221_s17, 0 }
  0x49   : > { %s1133_s19 = sand.u32 (!%p1226_p0), 1, %s952_s10   ;;  %p1227_p5 = scmp.ne.s32.totalorder (!%p1226_p0), %s1219_s15, 0 }
  0x4a   : > { %146 = sbr.rel (%p1226_p0) target bundleno = 1037 (0x40d), region = 28  ;;  %s697_s29 = sshll.u32 (!%p1226_p0), %s1133_s19, 3 }
  0x4b   : > { %s149_s30 = scalar_lea.sflag (!%p1226_p0), [#allocation4], %s1133_s19  ;;  %s152_s3 = scalar_lea.vmem (!%p1226_p0), [#allocation3], %s697_s29 }
  0x51   : > { %935 = dma.done.wait (%p1227_p5), %s149_s30, 128  }
  0x52   : > { %937 = vsyncadd (%p1227_p5), %s149_s30, 4294967168  ;;  %p1228_p2 = scmp.eq.s32.totalorder %s1009_s13, 0 }
  0x54   : > { %939 = dma.done.wait (%p1228_p2), [#allocation7], 256   ;;  %p1229_p11 = pmov %p1228_p2 }
  0x55   : > { %v966_v0 = vmov 0.0   ;;  %vm967_vm0 = vmmov 0   ;;  %v821_v1 = vld [vmem:[#allocation6] sm:$0xff]   ;;  %v822_v2 = vld [vmem:[#allocation6 + $0x8] sm:$0xff]   ;;  %v823_v3 = vld [vmem:[%s152_s3] sm:$0xff]   ;;  %vm203_vm1 = vcmask 261120   ;;  %v408_v13 = vlaneseq }
  0x56   : > { %941 = vsyncadd (%p1229_p11), [#allocation7], 4294967040  ;;  %728 = vmatprep.subr.bf16.mxu0 %v966_v0  ;;  %732 = vmatprep.mubr.msk.bf16.mxu0 %vm967_vm0, %v966_v0  ;;  %vm248_vm2 = vcmask 392192   ;;  %s968_s15 = smov 112   ;;  %s969_s17 = smov 96   ;;  %vm256_vm3 = vcmask 130048  }
  0x57   : > { %736 = vmatprep.subr.mxu1 %v966_v0  ;;  %738 = vmatprep.mubr.msk.f32.mxu1 %vm967_vm0, %v966_v0  ;;  %v409_v14 = vshrl.u32 %v408_v13, 7  ;;  %v411_v15 = vand.u32 127, %v408_v13  ;;  %vm415_vm5 = vcmask 64512   ;;  %s699_s4 = sshll.u32 %s1133_s19, 4  ;;  %s716_s22 = sshll.u32 %s1009_s13, 8 }
  0x58   : > { %729 = vmatpush3.bf16.msra.mxu0 %v821_v1  ;;  %s176_s5 = scalar_lea.vmem [#allocation8], %s699_s4  ;;  %s1168_s6 = scalar_lea.hbm %s1215_s2, %s716_s22 }
  0x59   : > { %730 = vmatprep.subr.bf16.mxu0 %v966_v0  ;;  %vm412_vm4 = vcmp.le.s32.totalorder %v411_v15, %v409_v14  ;;  %s606_s27 = sshll.u32 %s176_s5, 4  ;;  %s593_s7 = scalar_lea.sflag [#allocation5], %s1133_s19  ;;  %s1163_s27 = int_to_ptr.vmem [resolvable:$true] %s606_s27 }
  0x5a   : > { %s890_s13 = scalar_lea.vmem %s1163_s27, 256  ;;  %s970_s20 = smov [#allocation8]  }
  0x5b   : > { %p891_p4 = scmp.ne.s32.totalorder %s1163_s27, %s890_s13  ;;  %s894_s18 = sshll.u32 %s970_s20, 4  ;;  %s895_s18 = int_to_ptr.vmem [resolvable:$false] %s894_s18 }
  0x5c   : > { %731 = vmatpush3.bf16.msra.mxu0 %v822_v2  ;;  %s896_s24 = scalar_lea.vmem %s895_s18, 512  ;;  %p897_p10 = scmp.lt.s32.totalorder %s1163_s27, %s895_s18 }
  0x5d   : > { %751 = vmatprep.subr.mxu0 %v966_v0  ;;  %p892_p6 = pnand %p891_p4, %p1082_p12  ;;  %p898_p13 = scmp.lt.s32.totalorder %s896_s24, %s890_s13 }
  0x5f   : > { %733 = vmatmul.mubr.msk.bf16.vlgmr.msra.gmra.mrb[0].mxu0 %vm203_vm1, %v823_v3  ;;  %p893_p8 = pneg %p892_p6  ;;  %p899_p3 = por %p898_p13, %p897_p10 }
  0x60   : > { %753 = vmatprep.mubr.msk.f32.mxu0 %vm967_vm0, %v966_v0 }
  0x61   : > { %p900_p7 = pnand %p899_p3, %p893_p8 }
 0x132   : > { %v241_v4 = vpop.f32.mrb[0].mxu0 }
 0x133   : > { %249 = vst.msk [vmem:[#allocation2] sm:$0xff] %vm248_vm2, %v241_v4  ;;  %v734_v5 = vpop.f32.mrb[1].mxu0 }
 0x134   : > { %v244_v6 = vpop.f32.mrb[2].mxu0 }
 0x135   : > { %250 = vst.msk [vmem:[#allocation2 + $0x8] sm:$0xff] %vm248_vm2, %v244_v6  ;;  %v735_v7 = vpop.f32.mrb[3].mxu0 }
 0x13a   : > { %v251_v8 = vld [vmem:[#allocation2] sm:$0xff] }
 0x13b   : > { %254 = vrot.lane.b32.xlu0 %v251_v8, %s968_s15 }
 0x13c   : > { %v252_v9 = vld [vmem:[#allocation2 + $0x8] sm:$0xff] }
 0x13f   : > { %332 = vrot.lane.b32.xlu0 %v252_v9, %s968_s15 }
 0x143   : > { %436 = vrot.lane.b32.xlu0 %v251_v8, %s969_s17 }
 0x1ad   : > { %v255_v10 = vpop.permute.xlu0 %254 }
 0x1ae   : > { %737 = vmatpush3.xpose.msk.msra.mxu1 %vm256_vm3, %v255_v10 }
 0x1af   : > { %741 = vmatprep.subr.mxu1 %v966_v0 }
 0x1b1   : > { %739 = vmatmul.mubr.msk.f32.vlgmr.msra.gmra.mrb[0].mxu1 %vm256_vm3, %v251_v8  ;;  %v333_v11 = vpop.permute.xlu0 %332 }
 0x1b2   : > { %742 = vmatpush3.xpose.msk.msra.mxu1 %vm256_vm3, %v333_v11  ;;  %743 = vmatprep.mubr.msk.f32.mxu1 %vm967_vm0, %v966_v0 }
 0x1b3   : > { %746 = vmatprep.subr.mxu1 %v966_v0 }
 0x1b5   : > { %744 = vmatmul.mubr.msk.f32.vlgmr.msra.gmra.mrb[2].mxu1 %vm256_vm3, %v252_v9  ;;  %v437_v12 = vpop.permute.xlu0 %436 }
 0x1b6   : > { %747 = vmatpush3.msra.mxu1 %v437_v12  ;;  %748 = vmatprep.mubr.msk.f32.mxu1 %vm967_vm0, %v966_v0 }
 0x284   : > { %v327_v16 = vpop.f32.mrb[0].mxu1 }
 0x285   : > { %v413_v17 = vsel %vm412_vm4, %v327_v16, -1e+30  ;;  %v740_v18 = vpop.f32.mrb[1].mxu1 }
 0x286   : > { %v416_v19 = vsel %vm415_vm5, %v413_v17, -inf }
 0x287   : > { %417 = vmax.xlane.f32.xlu1 %v416_v19 }
 0x288   : > { %v404_v20 = vpop.f32.mrb[2].mxu1 }
 0x289   : > { %v414_v21 = vsel %vm412_vm4, %v404_v20, -1e+30  ;;  %v745_v22 = vpop.f32.mrb[3].mxu1 }
 0x28a   : > { %v419_v23 = vsel %vm415_vm5, %v414_v21, -inf }
 0x28b   : > { %420 = vmax.xlane.f32.xlu1 %v419_v23 }
 0x29c   : > { %512 = vrot.lane.b32.xlu1 %v252_v9, %s969_s17 }
 0x314   : > { %v418_v24 = vpop.xlane.xlu1 %417 }
 0x315   : > { %v422_v25 = vsub.f32 %v413_v17, %v418_v24 }
 0x317   : > { %v424_v26 = vmul.f32 1.442695, %v422_v25 }
 0x318   : > { %v421_v27 = vpop.xlane.xlu1 %420 }
 0x319   : > { %824 = vpow2.f32 %v424_v26  ;;  %v423_v28 = vsub.f32 %v414_v21, %v421_v27 }
 0x31b   : > { %v426_v29 = vmul.f32 1.442695, %v423_v28 }
 0x31c   : > { %v513_v30 = vpop.permute.xlu1 %512 }
 0x31d   : > { %826 = vpow2.f32 %v426_v29  ;;  %752 = vmatpush3.msra.mxu0 %v513_v30 }
 0x323   : > { %v825_v31 = vpop.eup %824 }
 0x324   : > { %749 = vmatmul.mubr.msk.f32.vlgmr.msra.gmra.mrb[4].mxu1 %vm415_vm5, %v825_v31  ;;  %v428_v32 = vsel %vm415_vm5, %v825_v31, 0.0 }
 0x325   : > { %429 = vadd.xlane.f32.xlu0 %v428_v32 }
 0x327   : > { %v827_v33 = vpop.eup %826 }
 0x328   : > { %754 = vmatmul.mubr.msk.f32.vlgmr.msra.gmra.mrb[4].mxu0 %vm415_vm5, %v827_v33  ;;  %v431_v34 = vsel %vm415_vm5, %v827_v33, 0.0 }
 0x329   : > { %432 = vadd.xlane.f32.xlu1 %v431_v34 }
 0x3b2   : > { %v430_v35 = vpop.xlane.xlu0 %429 }
 0x3b3   : > { %828 = vrcp.f32 %v430_v35 }
 0x3b6   : > { %v433_v36 = vpop.xlane.xlu1 %432 }
 0x3b7   : > { %830 = vrcp.f32 %v433_v36 }
 0x3bd   : > { %v829_v37 = vpop.eup %828 }
 0x3c1   : > { %v831_v41 = vpop.eup %830 }
 0x3f7   : > { %v508_v38 = vpop.f32.mrb[4].mxu1 }
 0x3f8   : > { %v588_v39 = vmul.f32 %v829_v37, %v508_v38  ;;  %v750_v40 = vpop.f32.mrb[5].mxu1 }
 0x3fa   : > { %590 = vst.msk [vmem:[%s176_s5] sm:$0xff] %vm256_vm3, %v588_v39 }
 0x3fb   : > { %v584_v42 = vpop.f32.mrb[4].mxu0 }
 0x3fc   : > { %v589_v43 = vmul.f32 %v831_v41, %v584_v42  ;;  %v755_v44 = vpop.f32.mrb[5].mxu0 }
 0x3fe   : > { %591 = vst.msk [vmem:[%s176_s5 + $0x8] sm:$0xff] %vm256_vm3, %v589_v43 }
 0x3ff   : > { %903 = shalt.err (!%p900_p7)
}
 0x400   : > { %s904_s25 = scalar_lea.hbm %s1168_s6, 256  ;;  %s908_s30 = scalar_lea.hbm %s1215_s2, 512 }
 0x401   : > { %p905_p9 = scmp.ne.s32.totalorder %s1168_s6, %s904_s25  ;;  %p909_p5 = scmp.lt.u32.totalorder %s1168_s6, %s1215_s2 }
 0x402   : > { %p910_p2 = scmp.lt.u32.totalorder %s908_s30, %s904_s25  ;;  %p912_p4 = scmp.lt.u32.totalorder %s904_s25, %s1168_s6 }
 0x403   : > { %p906_p1 = pnand %p905_p9, %p1082_p12 }
 0x404   : > { %p911_p11 = por %p910_p2, %p909_p5 }
 0x405   : > { %p907_p0 = pneg %p906_p1 }
 0x406   : > { %p913_p6 = por %p912_p4, %p911_p11 }
 0x408   : > { %p914_p8 = pnand %p913_p6, %p907_p0 }
 0x40a   : > { %917 = shalt.err (!%p914_p8)
}
 0x40b   : > { %s971_s17 = smov 128   ;;  %s972_s4 = smov 8  }
 0x40c   : > { %762 = dma.vmem_to_hbm [thread:$0]  (%p1082_p12), %s1163_s27, 256, %s1168_s6, %s593_s7, %s971_s17, %s971_s17, %s972_s4  }
 0x40d PF: > { %s621_s5 = sand.u32 1, %s948_s9   ;;  %p1230_p10 = scmp.ne.s32.totalorder %s1220_s16, 0 }
 0x40e   : > { %p1231_p13 = scmp.ge.s32.totalorder %s960_s12, 2  ;;  %s622_s22 = scalar_lea.sflag [#allocation5], %s621_s5 }
 0x410   : > { %p773_p3 = pnand %p1231_p13, %p1230_p10 }
 0x412   : > { %943 = dma.done.wait (!%p773_p3), %s622_s22, 256  }
 0x413   : > { %945 = vsyncadd (!%p773_p3), %s622_s22, 4294967040  ;;  %p16_p7 = scmp.ge.s32.totalorder %s1044_s21, 4   ;;  %s1232_s9 = smov %s952_s10 }
 0x414   : > { %s1233_s10 = smov %s956_s11  ;;  %s1234_s11 = smov %s1078_s8 }
 0x415   : > { %s1235_s12 = smov %s1044_s21  ;;  %18 = sbr.rel (!%p16_p7) target bundleno = 6 (0x6), region = 77 }
 0x41c   :  { %627 = vsyncpa [#allocation4], 1 }
 0x41d   :  { %629 = vsyncpa [#allocation4 + $0x1], 1 }
 0x41e   :  { %630 = vsyncpa [#allocation7], 1 }
 0x41f   :  { %631 = vsyncpa [#allocation5], 1 }
 0x420   :  { %633 = vsyncpa [#allocation5 + $0x1], 1 }

</bundles_post_ra>
